<compile_context>
chip_gen: v5e
topology: v5e:2x2
jax: 0.10.0
libtpu: 0.0.40
codegen_flags: <defaults>
</compile_context>

<pallas_src>
import functools

import jax
import jax.numpy as jnp
from jax.experimental import pallas as pl
from jax.experimental.pallas import tpu as pltpu


# ---------------------------------------------------------------------------
# VMEM budgeting (bytes).  The pipelined working set is (in + out) blocks,
# each double-buffered => 4 copies of one block.  48 MiB scoped VMEM is legal
# on every generation (>= 64 MiB physical) and leaves headroom on v7x.
_VMEM_LIMIT_BYTES = 48 * 1024 * 1024
_BLOCK_BUDGET_BYTES = 32 * 1024 * 1024   # total for the 4 block copies


# ---------------------------------------------------------------------------
# Exact (erf) GELU, matching PyTorch nn.GELU() default.
_SQRT1_2 = 0.7071067811865476
_ERF_P, _ERF_A1, _ERF_A2, _ERF_A3, _ERF_A4, _ERF_A5 = (
    0.3275911, 0.254829592, -0.284496736, 1.421413741, -1.453152027, 1.061405429)


def _erf(x):
    # Abramowitz & Stegun 7.1.26, |err| <= 1.5e-7.  Uses only exp/abs/where/FMA
    # so it is guaranteed to lower in Mosaic (lax.erf_p lowering inside Pallas
    # TPU kernels is not guaranteed across versions).
    a = jnp.abs(x)
    t = 1.0 / (1.0 + _ERF_P * a)
    poly = ((((_ERF_A5 * t + _ERF_A4) * t + _ERF_A3) * t + _ERF_A2) * t + _ERF_A1) * t
    e = 1.0 - poly * jnp.exp(-a * a)
    return jnp.where(x >= 0, e, -e)


def _gelu_exact(x):
    return 0.5 * x * (1.0 + _erf(x * _SQRT1_2))


# ---------------------------------------------------------------------------
# Fused single-pass kernel: pool + FC + GELU + FC + sigmoid + scale on one
# resident (bT, C, HW) block.
def _se_fused_kernel(x_ref, w1t_ref, w2t_ref, o_ref, *, inv_hw):
    x = x_ref[...]                                                        # (bT, C, HW)
    mean = jnp.sum(x.astype(jnp.float32), axis=-1) * inv_hw               # (bT, C)
    h = jnp.dot(mean, w1t_ref[...], preferred_element_type=jnp.float32)   # (bT, Ch)
    h = _gelu_exact(h)
    g = jnp.dot(h, w2t_ref[...], preferred_element_type=jnp.float32)      # (bT, C)
    gate = jax.nn.sigmoid(g).astype(x.dtype)                              # (bT, C)
    o_ref[...] = (x * gate[:, :, None]).astype(o_ref.dtype)


# ---------------------------------------------------------------------------
# Fallback (large feature maps): pool kernel (HW reduction) + scale kernel,
# bottleneck FC as a batched XLA matmul in between.
def _se_pool_kernel(x_ref, sum_ref):
    @pl.when(pl.program_id(1) == 0)
    def _():
        sum_ref[...] = jnp.zeros_like(sum_ref)

    # x_ref: (1, C, T) tile -> per-channel partial sums in the resident output block.
    sum_ref[...] += jnp.sum(x_ref[...].astype(jnp.float32), axis=-1, keepdims=True)


def _se_scale_kernel(x_ref, gate_ref, o_ref):
    # out = x * gate, gate broadcast along the lane (HW) axis.
    o_ref[...] = (x_ref[...] * gate_ref[...]).astype(o_ref.dtype)


def _pick_hw_tile(hw, c, dsize, per_block_budget):
    """Largest lane tile (multiple of 128) fitting the per-block VMEM budget.

    Returns (hw_tile, hw_padded): if no multiple of 128 divides hw, hw is padded
    (with zeros in the wrapper) so stores stay unmasked lane-dense.
    """
    max_lanes = max(128, (per_block_budget // max(1, c * dsize)) // 128 * 128)
    # TODO(synk): if even a 128-lane tile exceeds the budget (huge C), C should
    # also be tiled; not needed for realistic SE channel counts.
    t = min(max_lanes, (hw // 128) * 128)
    while t >= 128:
        if hw % t == 0:
            return t, hw
        t -= 128
    hw_p = ((hw + 127) // 128) * 128
    t = min(max_lanes, hw_p)
    while t >= 128:
        if hw_p % t == 0:
            return t, hw_p
        t -= 128
    return 128, hw_p


# ---------------------------------------------------------------------------
def se_forward(x_nchw, fc1_weight, fc2_weight, *,
               block_budget_bytes=_BLOCK_BUDGET_BYTES,
               vmem_limit_bytes=_VMEM_LIMIT_BYTES):
    """SE forward.  x_nchw: (B, C, H, W); fc1_weight: (Ch, C); fc2_weight: (C, Ch)."""
    B, C, H, W = x_nchw.shape
    Ch = fc1_weight.shape[0]
    assert fc1_weight.shape == (Ch, C) and fc2_weight.shape == (C, Ch)

    HW = H * W
    dsize = jnp.dtype(x_nchw.dtype).itemsize
    per_block_budget = block_budget_bytes // 4   # in + out blocks, double-buffered

    x = x_nchw.reshape(B, C, HW)                 # free contiguous view, no transpose
    w1t = fc1_weight.astype(jnp.float32).T       # (C, Ch)  (host transpose, tiny)
    w2t = fc2_weight.astype(jnp.float32).T       # (Ch, C)

    slab_bytes = C * HW * dsize

    # ---------------- Fused single-pass path (1R + 1W of x) ----------------
    if slab_bytes <= per_block_budget:
        bT = 1
        for cand in range(B, 0, -1):             # largest divisor of B within budget
            if B % cand == 0 and cand * slab_bytes <= per_block_budget:
                bT = cand
                break
        n_b = B // bT

        out = pl.pallas_call(
            functools.partial(_se_fused_kernel, inv_hw=1.0 / HW),
            out_shape=jax.ShapeDtypeStruct((B, C, HW), x_nchw.dtype),
            grid_spec=pltpu.PrefetchScalarGridSpec(
                num_scalar_prefetch=0,
                grid=(n_b,),
                in_specs=[
                    pl.BlockSpec((bT, C, HW), lambda i: (i, 0, 0)),   # x slab
                    pl.BlockSpec((C, Ch), lambda i: (0, 0)),          # fc1^T (resident)
                    pl.BlockSpec((Ch, C), lambda i: (0, 0)),          # fc2^T (resident)
                ],
                out_specs=pl.BlockSpec((bT, C, HW), lambda i: (i, 0, 0)),
            ),
            compiler_params=pltpu.CompilerParams(
                dimension_semantics=("parallel",),
                vmem_limit_bytes=vmem_limit_bytes),
        )(x, w1t, w2t)
        return out.reshape(B, C, H, W)

    # ------------- Fallback two-pass path (slab > VMEM budget) -------------
    hw_tile, HWp = _pick_hw_tile(HW, C, dsize, per_block_budget)
    if HWp != HW:
        # Zero padding: sums (and hence the mean, divided by the true HW) are
        # unaffected; padded output lanes are sliced off below.
        x = jnp.pad(x, ((0, 0), (0, 0), (0, HWp - HW)))
    n_hw = HWp // hw_tile

    # Kernel A: global average pool (HW reduction accumulated in the resident
    # output block).
    sums = pl.pallas_call(
        _se_pool_kernel,
        out_shape=jax.ShapeDtypeStruct((B, C, 1), jnp.float32),
        grid_spec=pltpu.PrefetchScalarGridSpec(
            num_scalar_prefetch=0,
            grid=(B, n_hw),
            in_specs=[pl.BlockSpec((1, C, hw_tile), lambda b, j: (b, 0, j))],
            out_specs=pl.BlockSpec((1, C, 1), lambda b, j: (b, 0, 0)),
        ),
        compiler_params=pltpu.CompilerParams(
            dimension_semantics=("parallel", "arbitrary"),
            vmem_limit_bytes=vmem_limit_bytes),
    )(x)

    # Bottleneck FC as one batched matmul in XLA (tiny FLOPs, off the critical
    # reduction path, frees the weights from kernel-A VMEM).
    mean = sums[:, :, 0] * (1.0 / HW)                               # (B, C)
    h = jax.nn.gelu(mean @ w1t, approximate=False)                  # (B, Ch) exact GELU
    gate = jax.nn.sigmoid(h @ w2t)[:, :, None].astype(jnp.float32)  # (B, C, 1)

    # Kernel B: broadcast-scale x by the per-channel gate (lane-dense output).
    out = pl.pallas_call(
        _se_scale_kernel,
        out_shape=jax.ShapeDtypeStruct((B, C, HWp), x_nchw.dtype),
        grid_spec=pltpu.PrefetchScalarGridSpec(
            num_scalar_prefetch=0,
            grid=(B, n_hw),
            in_specs=[
                pl.BlockSpec((1, C, hw_tile), lambda b, j: (b, 0, j)),
                pl.BlockSpec((1, C, 1), lambda b, j: (b, 0, 0)),
            ],
            out_specs=pl.BlockSpec((1, C, hw_tile), lambda b, j: (b, 0, j)),
        ),
        compiler_params=pltpu.CompilerParams(
            dimension_semantics=("parallel", "parallel"),
            vmem_limit_bytes=vmem_limit_bytes),
    )(x, gate)

    if HWp != HW:
        out = out[:, :, :HW]
    return out.reshape(B, C, H, W)


# ---------------------------------------------------------------------------
def reference(x, fc1_weight, fc2_weight):
    """Pure-JAX reference of SE.forward (exact erf GELU, like PyTorch nn.GELU)."""
    y = jnp.mean(x, axis=(2, 3))                                    # (B, C)
    y = jax.nn.gelu(y @ fc1_weight.T, approximate=False)            # (B, Ch)
    y = jax.nn.sigmoid(y @ fc2_weight.T)                            # (B, C)
    return x * y[:, :, None, None]


if __name__ == "__main__":
    key = jax.random.PRNGKey(0)
    B, C, H, W = 2, 32, 16, 16
    expansion = 0.25
    Ch = int(C * expansion)          # SE bottleneck width (= 8)

    kx, k1, k2 = jax.random.split(key, 3)
    x = jax.random.normal(kx, (B, C, H, W), dtype=jnp.float32)
    # nn.Linear(oup, int(inp*expansion), bias=False).weight -> (Ch, C)
    fc1_w = 0.1 * jax.random.normal(k1, (Ch, C), dtype=jnp.float32)
    # nn.Linear(int(inp*expansion), oup, bias=False).weight -> (C, Ch)
    fc2_w = 0.1 * jax.random.normal(k2, (C, Ch), dtype=jnp.float32)

    ref = reference(x, fc1_w, fc2_w)

    # Primary fused single-pass path (per-batch slab fits VMEM).
    out_fused = jax.block_until_ready(se_forward(x, fc1_w, fc2_w))
    assert out_fused.shape == (B, C, H, W)
    assert jnp.allclose(out_fused, ref, atol=1e-5, rtol=1e-5)

    # Force the two-pass (pool + scale) fallback with a tiny block budget so the
    # large-feature-map path is exercised too.
    out_split = jax.block_until_ready(
        se_forward(x, fc1_w, fc2_w, block_budget_bytes=64 * 1024))
    assert out_split.shape == (B, C, H, W)
    assert jnp.allclose(out_split, ref, atol=1e-5, rtol=1e-5)

    print("KERNEL_OK")
</pallas_src>

<mosaic_0001>
module attributes {stable_mosaic.version = 11 : i64} {
  func.func @_se_fused_kernel(%arg0: i32, %arg1: memref<2x32x256xf32, #tpu.memory_space<vmem>>, %arg2: memref<32x8xf32, #tpu.memory_space<vmem>>, %arg3: memref<8x32xf32, #tpu.memory_space<vmem>>, %arg4: memref<2x32x256xf32, #tpu.memory_space<vmem>>) attributes {dimension_semantics = [#tpu.dimension_semantics<parallel>], iteration_bounds = array<i64: 1>, scalar_prefetch = 0 : i64, scratch_operands = 0 : i64, tpu.core_type = #tpu.core_type<tc>, window_params = [{transform_indices = @transform_0, window_bounds = array<i64: 2, 32, 256>}, {pipeline_mode = #tpu.pipeline_mode<synchronous>, transform_indices = @transform_1, window_bounds = array<i64: 32, 8>}, {pipeline_mode = #tpu.pipeline_mode<synchronous>, transform_indices = @transform_2, window_bounds = array<i64: 8, 32>}, {transform_indices = @transform_3, window_bounds = array<i64: 2, 32, 256>}]} {
    %c0 = arith.constant 0 : index
    %c0_0 = arith.constant 0 : index
    %c0_1 = arith.constant 0 : index
    %0 = vector.load %arg1[%c0, %c0_0, %c0_1] : memref<2x32x256xf32, #tpu.memory_space<vmem>>, vector<2x32x256xf32>
    %cst = arith.constant dense<0.000000e+00> : vector<2x32xf32>
    %1 = vector.multi_reduction <add>, %0, %cst [2] : vector<2x32x256xf32> to vector<2x32xf32>
    %cst_2 = arith.constant 3.906250e-03 : f32
    %2 = vector.broadcast %cst_2 : f32 to vector<2x32xf32>
    %3 = arith.mulf %1, %2 : vector<2x32xf32>
    %c0_3 = arith.constant 0 : index
    %c0_4 = arith.constant 0 : index
    %4 = vector.load %arg2[%c0_3, %c0_4] : memref<32x8xf32, #tpu.memory_space<vmem>>, vector<32x8xf32>
    %cst_5 = arith.constant dense<0.000000e+00> : vector<2x8xf32>
    %5 = tpu.matmul %3, %4, %cst_5 {dimension_numbers = #tpu.dot_dimension_numbers<[1], [0], [0], [1], [0, 0, 1, 1], [], []>} : vector<2x32xf32>, vector<32x8xf32>, vector<2x8xf32> -> vector<2x8xf32>
    %cst_6 = arith.constant 5.000000e-01 : f32
    %6 = vector.broadcast %cst_6 : f32 to vector<2x8xf32>
    %7 = arith.mulf %6, %5 : vector<2x8xf32>
    %cst_7 = arith.constant 0.707106769 : f32
    %8 = vector.broadcast %cst_7 : f32 to vector<2x8xf32>
    %9 = arith.mulf %5, %8 : vector<2x8xf32>
    %10 = math.absf %9 : vector<2x8xf32>
    %cst_8 = arith.constant 0.327591091 : f32
    %11 = vector.broadcast %cst_8 : f32 to vector<2x8xf32>
    %12 = arith.mulf %11, %10 : vector<2x8xf32>
    %cst_9 = arith.constant 1.000000e+00 : f32
    %13 = vector.broadcast %cst_9 : f32 to vector<2x8xf32>
    %14 = arith.addf %13, %12 : vector<2x8xf32>
    %cst_10 = arith.constant 1.000000e+00 : f32
    %15 = vector.broadcast %cst_10 : f32 to vector<2x8xf32>
    %16 = arith.divf %15, %14 : vector<2x8xf32>
    %cst_11 = arith.constant 1.06140542 : f32
    %17 = vector.broadcast %cst_11 : f32 to vector<2x8xf32>
    %18 = arith.mulf %17, %16 : vector<2x8xf32>
    %cst_12 = arith.constant -1.45315206 : f32
    %19 = vector.broadcast %cst_12 : f32 to vector<2x8xf32>
    %20 = arith.addf %18, %19 : vector<2x8xf32>
    %21 = arith.mulf %20, %16 : vector<2x8xf32>
    %cst_13 = arith.constant 1.42141378 : f32
    %22 = vector.broadcast %cst_13 : f32 to vector<2x8xf32>
    %23 = arith.addf %21, %22 : vector<2x8xf32>
    %24 = arith.mulf %23, %16 : vector<2x8xf32>
    %cst_14 = arith.constant -0.284496725 : f32
    %25 = vector.broadcast %cst_14 : f32 to vector<2x8xf32>
    %26 = arith.addf %24, %25 : vector<2x8xf32>
    %27 = arith.mulf %26, %16 : vector<2x8xf32>
    %cst_15 = arith.constant 0.254829586 : f32
    %28 = vector.broadcast %cst_15 : f32 to vector<2x8xf32>
    %29 = arith.addf %27, %28 : vector<2x8xf32>
    %30 = arith.mulf %29, %16 : vector<2x8xf32>
    %cst_16 = arith.constant 0.000000e+00 : f32
    %31 = vector.broadcast %cst_16 : f32 to vector<2x8xf32>
    %32 = arith.subf %31, %10 : vector<2x8xf32>
    %33 = arith.mulf %32, %10 : vector<2x8xf32>
    %34 = math.exp %33 : vector<2x8xf32>
    %35 = arith.mulf %30, %34 : vector<2x8xf32>
    %cst_17 = arith.constant 1.000000e+00 : f32
    %36 = vector.broadcast %cst_17 : f32 to vector<2x8xf32>
    %37 = arith.subf %36, %35 : vector<2x8xf32>
    %cst_18 = arith.constant 0.000000e+00 : f32
    %38 = vector.broadcast %cst_18 : f32 to vector<2x8xf32>
    %39 = arith.cmpf oge, %9, %38 : vector<2x8xf32>
    %cst_19 = arith.constant 0.000000e+00 : f32
    %40 = vector.broadcast %cst_19 : f32 to vector<2x8xf32>
    %41 = arith.subf %40, %37 : vector<2x8xf32>
    %42 = arith.select %39, %37, %41 : vector<2x8xi1>, vector<2x8xf32>
    %cst_20 = arith.constant 1.000000e+00 : f32
    %43 = vector.broadcast %cst_20 : f32 to vector<2x8xf32>
    %44 = arith.addf %43, %42 : vector<2x8xf32>
    %45 = arith.mulf %7, %44 : vector<2x8xf32>
    %c0_21 = arith.constant 0 : index
    %c0_22 = arith.constant 0 : index
    %46 = vector.load %arg3[%c0_21, %c0_22] : memref<8x32xf32, #tpu.memory_space<vmem>>, vector<8x32xf32>
    %cst_23 = arith.constant dense<0.000000e+00> : vector<2x32xf32>
    %47 = tpu.matmul %45, %46, %cst_23 {dimension_numbers = #tpu.dot_dimension_numbers<[1], [0], [0], [1], [0, 0, 1, 1], [], []>} : vector<2x8xf32>, vector<8x32xf32>, vector<2x32xf32> -> vector<2x32xf32>
    %48 = arith.negf %47 : vector<2x32xf32>
    %49 = math.exp %48 : vector<2x32xf32>
    %cst_24 = arith.constant 1.000000e+00 : f32
    %50 = vector.broadcast %cst_24 : f32 to vector<2x32xf32>
    %51 = arith.addf %50, %49 : vector<2x32xf32>
    %52 = arith.divf %50, %51 : vector<2x32xf32>
    %53 = vector.shape_cast %52 : vector<2x32xf32> to vector<2x32x1xf32>
    %54 = vector.broadcast %53 : vector<2x32x1xf32> to vector<2x32x256xf32>
    %55 = arith.mulf %0, %54 : vector<2x32x256xf32>
    %c0_25 = arith.constant 0 : index
    %c0_26 = arith.constant 0 : index
    %c0_27 = arith.constant 0 : index
    %56 = vector.load %arg4[%c0_25, %c0_26, %c0_27] : memref<2x32x256xf32, #tpu.memory_space<vmem>>, vector<2x32x256xf32>
    tpu.vector_store %arg4[%c0_25, %c0_26, %c0_27], %55 {strides = array<i32>} : memref<2x32x256xf32, #tpu.memory_space<vmem>>, vector<2x32x256xf32>,
    return
  }
  func.func @transform_0(%arg0: i32) -> (i32, i32, i32) {
    %c0_i32 = arith.constant 0 : i32
    %c0_i32_0 = arith.constant 0 : i32
    %c0_i32_1 = arith.constant 0 : i32
    return %arg0, %c0_i32, %c0_i32_0 : i32, i32, i32
  }
  func.func @transform_1(%arg0: i32) -> (i32, i32) {
    %c0_i32 = arith.constant 0 : i32
    %c0_i32_0 = arith.constant 0 : i32
    %c0_i32_1 = arith.constant 0 : i32
    return %c0_i32, %c0_i32_0 : i32, i32
  }
  func.func @transform_2(%arg0: i32) -> (i32, i32) {
    %c0_i32 = arith.constant 0 : i32
    %c0_i32_0 = arith.constant 0 : i32
    %c0_i32_1 = arith.constant 0 : i32
    return %c0_i32, %c0_i32_0 : i32, i32
  }
  func.func @transform_3(%arg0: i32) -> (i32, i32, i32) {
    %c0_i32 = arith.constant 0 : i32
    %c0_i32_0 = arith.constant 0 : i32
    %c0_i32_1 = arith.constant 0 : i32
    return %arg0, %c0_i32, %c0_i32_0 : i32, i32, i32
  }
}

</mosaic_0001>

<bundles_post_ra>
// kernel: tpu_custom_call.1
= control target key start
LH: loop header
LB: loop body
LE: loop exit
PB: predicated region body
PF: predicated region fallthrough
CT: control target
= control target key end

     0   :  { %8 = vsyncpa [#allocation3], 0  ;;  %s516_s0 = inlined_call_operand.hbm [shape: f32[2,32,256], index: 0, kind: input, shape index: {}]   ;;  %s517_s1 = inlined_call_operand.vmem [shape: f32[32,8], index: 1, kind: input, shape index: {}]   ;;  %s518_s2 = inlined_call_operand.vmem [shape: f32[8,32], index: 2, kind: input, shape index: {}]   ;;  %s519_s3 = inlined_call_operand.hbm [shape: f32[2,32,256], index: 3, kind: output, shape index: {}]  }
   0x1   :  { %9 = vsyncpa [#allocation4], 0  ;;  %s14_s14 = sshll.u32 %s516_s0, 4  ;;  %s399_s15 = smov [#allocation2]   ;;  %s15_s14 = int_to_ptr.hbm [resolvable:$true] %s14_s14 }
   0x2   :  { %s16_s16 = sshll.u32 %s399_s15, 4  ;;  %s400_s17 = smov 256   ;;  %s17_s16 = int_to_ptr.vmem [resolvable:$true] %s16_s16 }
   0x3   :  { %s401_s18 = smov 16  }
   0x4   :  { %22 = dma.hbm_to_vmem [thread:$0]  %s15_s14, 2048, %s17_s16, [#allocation3], %s400_s17, %s400_s17, %s401_s18  }
   0x5   :  { %395 = dma.done.wait [#allocation3], 2048  }
   0x6   :  { %396 = vsyncadd [#allocation3], 4294965248  ;;  %v429_v0 = vld [vmem:[#allocation2 + $0x40] sm:$0xff]  ;;  %v431_v1 = vld [vmem:[#allocation2 + $0x48] sm:$0xff]  ;;  %v91_v31 = vlaneseq  ;;  %vm96_vm0 = vcmask 130112   ;;  %vm100_vm1 = vcmask 195712  }
   0x7   :  { %v433_v2 = vld [vmem:[#allocation2] sm:$0xff]  ;;  %v59_v3 = vadd.f32 %v431_v1, %v429_v0  ;;  %v437_v4 = vld [vmem:[#allocation2 + $0x8] sm:$0xff]  ;;  %v447_v9 = vld [vmem:[#allocation2 + $0x50] sm:$0xff]  ;;  %vm104_vm2 = vcmask 261312   ;;  %vm113_vm3 = vcmask 1041409   ;;  %vm115_vm4 = vcmask 261120  }
   0x8   :  { %v439_v5 = vld [vmem:[#allocation2 + $0x20] sm:$0xff]  ;;  %v441_v6 = vld [vmem:[#allocation2 + $0x28] sm:$0xff]  ;;  %v47_v7 = vadd.f32 %v437_v4, %v433_v2  ;;  %v449_v10 = vld [vmem:[#allocation2 + $0x58] sm:$0xff]  ;;  %v92_v32 = vand.u32 127, %v91_v31  ;;  %vm179_vm10 = vcmask 64512   ;;  %s310_s30 = sshll.u32 %s519_s3, 4  ;;  %s311_s30 = int_to_ptr.hbm [resolvable:$true] %s310_s30 }
   0x9   :  { %v53_v8 = vadd.f32 %v441_v6, %v439_v5  ;;  %60 = vadd.xlane.f32.xlu1 %v59_v3  ;;  %v451_v11 = vld [vmem:[#allocation2 + $0x10] sm:$0xff]  ;;  %v453_v12 = vld [vmem:[#allocation2 + $0x18] sm:$0xff]  ;;  %v455_v13 = vld [vmem:[#allocation2 + $0x60] sm:$0xff]  ;;  %v62_v15 = vadd.f32 %v449_v10, %v447_v9 }
   0xa   :  { %48 = vadd.xlane.f32.xlu0 %v47_v7  ;;  %v457_v14 = vld [vmem:[#allocation2 + $0x68] sm:$0xff]  ;;  %v50_v16 = vadd.f32 %v453_v12, %v451_v11  ;;  %v465_v18 = vld [vmem:[#allocation2 + $0x70] sm:$0xff]  ;;  %v467_v19 = vld [vmem:[#allocation2 + $0x78] sm:$0xff]  ;;  %v94_v34 = vadd.s32 4294967288, %v92_v32  ;;  %v98_v43 = vadd.s32 4294967280, %v92_v32  ;;  %v102_v47 = vadd.s32 4294967272, %v92_v32 }
   0xb   :  { %54 = vadd.xlane.f32.xlu2 %v53_v8  ;;  %v65_v17 = vadd.f32 %v457_v14, %v455_v13  ;;  %v469_v20 = vld [vmem:[#allocation2 + $0x30] sm:$0xff]  ;;  %v471_v21 = vld [vmem:[#allocation2 + $0x38] sm:$0xff]  ;;  %v68_v22 = vadd.f32 %v467_v19, %v465_v18  ;;  %v80_v26 = vld [vmem:[%s517_s1 + $0x8] sm:$0xff] }
   0xc   :  { %v56_v23 = vadd.f32 %v471_v21, %v469_v20  ;;  %v82_v24 = vld [vmem:[%s517_s1 + $0x18] sm:$0xff]  ;;  %v81_v25 = vld [vmem:[%s517_s1 + $0x10] sm:$0xff]  ;;  %v79_v27 = vld [vmem:[%s517_s1] sm:$0xff] }
   0xd   :  { %130 = vmatpush.msra.mxu0 %v82_v24 }
   0xf   :  { %131 = vmatpush.msra.mxu0 %v81_v25 }
  0x11   :  { %63 = vadd.xlane.f32.xlu1 %v62_v15  ;;  %132 = vmatpush.msra.mxu0 %v80_v26 }
  0x12   :  { %51 = vadd.xlane.f32.xlu0 %v50_v16 }
  0x13   :  { %66 = vadd.xlane.f32.xlu2 %v65_v17  ;;  %133 = vmatpush.msra.mxu0 %v79_v27  ;;  %v178_v27 = vld [vmem:[%s518_s2] sm:$0xff]  ;;  %s402_s2 = smov [#allocation5]  }
  0x14   :  { %198 = vmatpush.msra.mxu1 %v178_v27  ;;  %s308_s27 = sshll.u32 %s402_s2, 4  ;;  %s309_s27 = int_to_ptr.vmem [resolvable:$true] %s308_s27 }
  0x19   :  { %69 = vadd.xlane.f32.xlu1 %v68_v22 }
  0x1a   :  { %57 = vadd.xlane.f32.xlu0 %v56_v23 }
  0x7c   :  { %v61_v28 = vpop.xlane.xlu1 %60 }
  0x7d   :  { %v49_v29 = vpop.xlane.xlu0 %48  ;;  %v75_v39 = vmul.f32 0.00390625, %v61_v28 }
  0x7e   :  { %v55_v30 = vpop.xlane.xlu2 %54  ;;  %v71_v40 = vmul.f32 0.00390625, %v49_v29 }
  0x7f   :  { %v106_v45 = vperm.slane %v75_v39, %v92_v32  ;;  %v73_v46 = vmul.f32 0.00390625, %v55_v30 }
  0x80   :  { %v93_v48 = vperm.slane %v71_v40, %v92_v32 }
  0x81   :  { %v99_v56 = vperm.slane %v73_v46, %v98_v43 }
  0x84   :  { %v64_v33 = vpop.xlane.xlu1 %63 }
  0x85   :  { %v76_v35 = vmul.f32 0.00390625, %v64_v33  ;;  %v52_v36 = vpop.xlane.xlu0 %51 }
  0x86   :  { %v67_v37 = vpop.xlane.xlu2 %66  ;;  %v72_v38 = vmul.f32 0.00390625, %v52_v36 }
  0x87   :  { %v77_v41 = vmul.f32 0.00390625, %v67_v37  ;;  %v107_v42 = vperm.slane %v76_v35, %v94_v34 }
  0x88   :  { %v95_v44 = vperm.slane %v72_v38, %v94_v34 }
  0x89   :  { %v109_v49 = vperm.slane %v77_v41, %v98_v43  ;;  %v108_v51 = vsel %vm96_vm0, %v107_v42, %v106_v45 }
  0x8a   :  { %v97_v54 = vsel %vm96_vm0, %v95_v44, %v93_v48 }
  0x8b   :  { %v110_v59 = vsel %vm100_vm1, %v109_v49, %v108_v51  ;;  %v101_v60 = vsel %vm100_vm1, %v99_v56, %v97_v54 }
  0x8c   :  { %v70_v50 = vpop.xlane.xlu1 %69 }
  0x8d   :  { %v78_v52 = vmul.f32 0.00390625, %v70_v50  ;;  %v58_v53 = vpop.xlane.xlu0 %57 }
  0x8e   :  { %v74_v55 = vmul.f32 0.00390625, %v58_v53  ;;  %v224_v53 = vshrl.u32 %v91_v31, 7 }
  0x8f   :  { %v111_v57 = vperm.slane %v78_v52, %v102_v47 }
  0x90   :  { %v103_v58 = vperm.slane %v74_v55, %v102_v47  ;;  %330 = vset.pattern.permute.xlu2 %v224_v53  ;;  %v237_v54 = vadd.s32 16, %v224_v53  ;;  %v231_v55 = vadd.s32 8, %v224_v53 }
  0x91   :  { %v112_v61 = vsel %vm104_vm2, %v111_v57, %v110_v59 }
  0x92   :  { %v105_v62 = vsel %vm104_vm2, %v103_v58, %v101_v60  ;;  %332 = vset.pattern.permute.xlu1 %v237_v54  ;;  %331 = vset.pattern.permute.xlu0 %v231_v55 }
  0x93   :  { %v114_v63 = vsel %vm113_vm3, %v112_v61, %v105_v62 }
  0x94   :  { %323 = vmatmul.msk.f32.vlgmr.msra.gmra.mxu0 %vm115_vm4, %v114_v63 }
 0x111   :  { %v135_v3 = vpop.f32.mrf.mxu0 }
 0x112   :  { %v139_v7 = vmul.f32 0.70710677, %v135_v3  ;;  %v138_v50 = vmul.f32 0.5, %v135_v3 }
 0x114   :  { %v140_v8 = vand.u32 2147483647, %v139_v7  ;;  %vm173_vm9 = vcmp.ge.f32.partialorder %v139_v7, 0.0 }
 0x116   :  { %v141_v15 = vmul.f32 0.3275911, %v140_v8  ;;  %v167_v33 = vsub.f32 0.0, %v140_v8 }
 0x118   :  { %v142_v16 = vadd.f32 1.0, %v141_v15  ;;  %v168_v36 = vmul.f32 %v167_v33, %v140_v8 }
 0x11a   :  { %339 = vrcp.f32 %v142_v16  ;;  %v154_v24 = vand.u32 2147483648, %v142_v16  ;;  %v152_v26 = vand.u32 2147483647, %v142_v16  ;;  %vm148_vm6 = vweird.f32 %v142_v16 }
 0x11b   :  { %v169_v39 = vmul.f32 1.442695, %v168_v36 }
 0x11c   :  { %v155_v29 = vor.u32 1.1754944e-38, %v154_v24  ;;  %vm153_vm8 = vcmp.eq.f32.partialorder %v152_v26, 8.507059e+37 }
 0x11d   :  { %341 = vpow2.f32 %v169_v39 }
 0x120   :  { %v340_v17 = vpop.eup %339 }
 0x121   :  { %v144_v22 = vmul.f32 %v340_v17, %v142_v16  ;;  %vm149_vm5 = vweird.f32 %v340_v17 }
 0x122   :  { %vm150_vm7 = vmor %vm148_vm6, %vm149_vm5 }
 0x123   :  { %v145_v23 = vsub.f32 1.0, %v144_v22  ;;  %v342_v45 = vpop.eup %341  ;;  %v243_v22 = vadd.s32 24, %v224_v53 }
 0x125   :  { %v146_v25 = vmul.f32 %v340_v17, %v145_v23 }
 0x127   :  { %v147_v28 = vadd.f32 %v340_v17, %v146_v25 }
 0x129   :  { %v151_v30 = vsel %vm150_vm7, %v340_v17, %v147_v28 }
 0x12a   :  { %v156_v32 = vsel %vm153_vm8, %v155_v29, %v151_v30 }
 0x12b   :  { %v158_v34 = vmul.f32 1.0614054, %v156_v32 }
 0x12d   :  { %v159_v35 = vadd.f32 -1.4531521, %v158_v34 }
 0x12f   :  { %v160_v37 = vmul.f32 %v159_v35, %v156_v32 }
 0x131   :  { %v161_v38 = vadd.f32 1.4214138, %v160_v37 }
 0x133   :  { %v162_v40 = vmul.f32 %v161_v38, %v156_v32 }
 0x135   :  { %v163_v41 = vadd.f32 -0.28449672, %v162_v40 }
 0x137   :  { %v164_v42 = vmul.f32 %v163_v41, %v156_v32 }
 0x139   :  { %v165_v43 = vadd.f32 0.2548296, %v164_v42 }
 0x13b   :  { %v166_v44 = vmul.f32 %v165_v43, %v156_v32 }
 0x13d   :  { %v171_v46 = vmul.f32 %v342_v45, %v166_v44 }
 0x13f   :  { %v172_v47 = vsub.f32 1.0, %v171_v46 }
 0x141   :  { %v174_v48 = vsub.f32 0.0, %v172_v47 }
 0x143   :  { %v175_v49 = vsel %vm173_vm9, %v172_v47, %v174_v48 }
 0x144   :  { %v176_v51 = vadd.f32 1.0, %v175_v49 }
 0x146   :  { %v177_v52 = vmul.f32 %v176_v51, %v138_v50 }
 0x148   :  { %324 = vmatmul.msk.f32.vlgmr.msra.gmra.mxu1 %vm179_vm10, %v177_v52 }
 0x1c5   :  { %v200_v56 = vpop.f32.mrf.mxu1 }
 0x1c6   :  { %v325_v57 = vmul.f32 -1.442695, %v200_v56 }
 0x1c8   :  { %343 = vpow2.f32 %v325_v57 }
 0x1ce   :  { %v344_v58 = vpop.eup %343 }
 0x1cf   :  { %v206_v59 = vadd.f32 1.0, %v344_v58 }
 0x1d1   :  { %345 = vrcp.f32 %v206_v59  ;;  %v218_v63 = vand.u32 2147483648, %v206_v59  ;;  %v216_v7 = vand.u32 2147483647, %v206_v59  ;;  %vm212_vm12 = vweird.f32 %v206_v59 }
 0x1d3   :  { %v219_v31 = vor.u32 1.1754944e-38, %v218_v63  ;;  %vm217_vm14 = vcmp.eq.f32.partialorder %v216_v7, 8.507059e+37 }
 0x1d7   :  { %v346_v60 = vpop.eup %345 }
 0x1d8   :  { %v208_v61 = vmul.f32 %v346_v60, %v206_v59  ;;  %vm213_vm11 = vweird.f32 %v346_v60 }
 0x1d9   :  { %vm214_vm13 = vmor %vm212_vm12, %vm213_vm11 }
 0x1da   :  { %v209_v62 = vsub.f32 1.0, %v208_v61 }
 0x1dc   :  { %v210_v3 = vmul.f32 %v346_v60, %v209_v62 }
 0x1de   :  { %v211_v8 = vadd.f32 %v346_v60, %v210_v3 }
 0x1e0   :  { %v215_v15 = vsel %vm214_vm13, %v346_v60, %v211_v8 }
 0x1e1   :  { %v220_v16 = vsel %vm217_vm14, %v219_v31, %v215_v15 }
 0x1e2   :  { %v222_v17 = vperm.slane %v220_v16, 0  ;;  %v247_v23 = vperm.slane %v220_v16, 1 }
 0x1e4   :  { %239 = vperm.xlu1 %332, %v222_v17   ;;  %233 = vperm.xlu0 %331, %v222_v17  }
 0x1e5   :  { %227 = vperm.xlu2 %330, %v222_v17  }
 0x1ec   :  { %335 = vset.pattern.permute.xlu1 %v231_v55  ;;  %338 = vset.pattern.permute.xlu0 %v243_v22 }
 0x1ed   :  { %333 = vset.pattern.permute.xlu2 %v243_v22 }
 0x1f4   :  { %258 = vperm.xlu1 %335, %v247_v23  }
 0x1f5   :  { %245 = vperm.xlu2 %333, %v222_v17  }
 0x1fc   :  { %337 = vset.pattern.permute.xlu1 %v243_v22 }
 0x1fd   :  { %334 = vset.pattern.permute.xlu2 %v224_v53 }
 0x204   :  { %270 = vperm.xlu1 %337, %v247_v23  }
 0x205   :  { %252 = vperm.xlu2 %334, %v247_v23  }
 0x20d   :  { %336 = vset.pattern.permute.xlu2 %v237_v54 }
 0x215   :  { %264 = vperm.xlu2 %336, %v247_v23  }
 0x23f   :  { %v228_v24 = vpop.permute.xlu2 %227 }
 0x240   :  { %v272_v25 = vmul.f32 %v228_v24, %v433_v2  ;;  %v273_v26 = vmul.f32 %v228_v24, %v437_v4 }
 0x242   :  { %288 = vst [vmem:[#allocation5] sm:$0xff] %v272_v25 }
 0x243   :  { %289 = vst [vmem:[#allocation5 + $0x8] sm:$0xff] %v273_v26 }
 0x24f   :  { %v246_v27 = vpop.permute.xlu2 %245 }
 0x250   :  { %v278_v28 = vmul.f32 %v246_v27, %v469_v20  ;;  %v279_v29 = vmul.f32 %v246_v27, %v471_v21 }
 0x252   :  { %294 = vst [vmem:[#allocation5 + $0x30] sm:$0xff] %v278_v28 }
 0x253   :  { %295 = vst [vmem:[#allocation5 + $0x38] sm:$0xff] %v279_v29 }
 0x256   :  { %v240_v30 = vpop.permute.xlu1 %239  ;;  %v234_v32 = vpop.permute.xlu0 %233 }
 0x257   :  { %v276_v33 = vmul.f32 %v240_v30, %v439_v5  ;;  %v277_v34 = vmul.f32 %v240_v30, %v441_v6  ;;  %v274_v35 = vmul.f32 %v234_v32, %v451_v11  ;;  %v275_v2 = vmul.f32 %v234_v32, %v453_v12 }
 0x259   :  { %292 = vst [vmem:[#allocation5 + $0x20] sm:$0xff] %v276_v33 }
 0x25a   :  { %293 = vst [vmem:[#allocation5 + $0x28] sm:$0xff] %v277_v34 }
 0x25b   :  { %290 = vst [vmem:[#allocation5 + $0x10] sm:$0xff] %v274_v35 }
 0x25c   :  { %291 = vst [vmem:[#allocation5 + $0x18] sm:$0xff] %v275_v2 }
 0x25f   :  { %v253_v4 = vpop.permute.xlu2 %252 }
 0x260   :  { %v280_v20 = vmul.f32 %v253_v4, %v429_v0  ;;  %v281_v21 = vmul.f32 %v253_v4, %v431_v1 }
 0x262   :  { %296 = vst [vmem:[#allocation5 + $0x40] sm:$0xff] %v280_v20 }
 0x263   :  { %297 = vst [vmem:[#allocation5 + $0x48] sm:$0xff] %v281_v21 }
 0x266   :  { %v259_v36 = vpop.permute.xlu1 %258 }
 0x267   :  { %v282_v5 = vmul.f32 %v259_v36, %v447_v9  ;;  %v283_v6 = vmul.f32 %v259_v36, %v449_v10 }
 0x269   :  { %298 = vst [vmem:[#allocation5 + $0x50] sm:$0xff] %v282_v5 }
 0x26a   :  { %299 = vst [vmem:[#allocation5 + $0x58] sm:$0xff] %v283_v6 }
 0x26f   :  { %v265_v11 = vpop.permute.xlu2 %264 }
 0x270   :  { %v284_v12 = vmul.f32 %v265_v11, %v455_v13  ;;  %v285_v37 = vmul.f32 %v265_v11, %v457_v14 }
 0x272   :  { %300 = vst [vmem:[#allocation5 + $0x60] sm:$0xff] %v284_v12 }
 0x273   :  { %301 = vst [vmem:[#allocation5 + $0x68] sm:$0xff] %v285_v37 }
 0x276   :  { %v271_v0 = vpop.permute.xlu1 %270 }
 0x277   :  { %v286_v1 = vmul.f32 %v271_v0, %v465_v18  ;;  %v287_v9 = vmul.f32 %v271_v0, %v467_v19 }
 0x279   :  { %302 = vst [vmem:[#allocation5 + $0x70] sm:$0xff] %v286_v1 }
 0x27a   :  { %303 = vst [vmem:[#allocation5 + $0x78] sm:$0xff] %v287_v9 }
 0x27b   :  { %316 = dma.vmem_to_hbm [thread:$0]  %s309_s27, 2048, %s311_s30, [#allocation4], %s400_s17, %s400_s17, %s401_s18  }
 0x27c   :  { %397 = dma.done.wait [#allocation4], 2048  }
 0x27d   :  { %398 = vsyncadd [#allocation4], 4294965248 }
 0x27e   :  { %321 = vsyncpa [#allocation3], 1 }
 0x27f   :  { %322 = vsyncpa [#allocation4], 1 }

</bundles_post_ra>
